<compile_context>
chip_gen: v7x
topology: tpu7x:2x2x1
jax: 0.10.0
libtpu: 0.0.40
codegen_flags: <defaults>
</compile_context>

<pallas_src>
import functools

import jax
import jax.numpy as jnp
from jax.experimental import pallas as pl
from jax.experimental.pallas import tpu as pltpu

LANE = 128
MAX_TM = 4096        # rows per tile: 4096*128*4B = 2 MiB/block (f32)
NUM_SHARDS = 2       # leading "parallel" axis; v7x has 2 TensorCores


def _round_up(x, m):
    return (x + m - 1) // m * m


def _hdr_loss_kernel(d_ref, t_ref, out_ref, *, eps, tm, rows_valid,
                     tiles_per_shard, needs_mask):
    """Accumulates per-shard partial sums of (d - t)^2 / (d + eps)^2."""
    p = pl.program_id(0)
    t = pl.program_id(1)

    @pl.when(t == 0)
    def _():
        out_ref[...] = jnp.zeros_like(out_ref)

    d = d_ref[...].astype(jnp.float32)
    tgt = t_ref[...].astype(jnp.float32)

    if needs_mask:
        # Rows past the logical end of the array (partial boundary tile, or a
        # clamped duplicate tile on the last shard) are forced to d == tgt == 1
        # so they contribute exactly zero to the sum.
        lin = p * tiles_per_shard + t                   # unclamped tile index
        row0 = lin * tm
        row_ids = row0 + jax.lax.broadcasted_iota(jnp.int32, (tm, LANE), 0)
        valid = row_ids < rows_valid
        one = jnp.float32(1.0)
        d = jnp.where(valid, d, one)
        tgt = jnp.where(valid, tgt, one)

    diff = d - tgt
    r = diff * pl.reciprocal(d + jnp.float32(eps), approx=False)
    tile_loss = r * r
    # (tm, 128) -> (tm//8, 8, 128) -> sum over leading axis: pure vreg adds
    # (VPU); no cross-lane/sublane XLU reduce in the hot loop.
    partial = tile_loss.reshape(tm // 8, 8, LANE).sum(axis=0)
    out_ref[0] += partial


def hdr_loss(denoised, target, eps=0.01):
    """Pallas TPU implementation of HDRLoss.forward."""
    assert denoised.shape == target.shape, "shape mismatch"
    n_elems = int(denoised.size)
    assert n_elems > 0

    itemsize = jnp.dtype(denoised.dtype).itemsize
    sublane = max(8, 32 // max(itemsize, 1))   # 8 (f32), 16 (bf16), 32 (8-bit)

    flat_d = denoised.reshape(-1)
    flat_t = target.reshape(-1)

    rows_raw = pl.cdiv(n_elems, LANE)
    if rows_raw <= MAX_TM:
        # Whole problem fits a single VMEM tile: one block, grid (1, 1).
        rows = _round_up(rows_raw, sublane)
        tm = rows
        num_tiles = 1
        num_shards = 1
    else:
        rows = rows_raw
        tm = MAX_TM
        num_tiles = pl.cdiv(rows, tm)
        num_shards = NUM_SHARDS if num_tiles >= NUM_SHARDS else 1

    pad = rows * LANE - n_elems
    if pad:
        # Pad BOTH tensors with the same value so diff == 0 there.
        flat_d = jnp.pad(flat_d, (0, pad), constant_values=1)
        flat_t = jnp.pad(flat_t, (0, pad), constant_values=1)

    d2 = flat_d.reshape(rows, LANE)
    t2 = flat_t.reshape(rows, LANE)

    tiles_per_shard = pl.cdiv(num_tiles, num_shards)
    needs_mask = (num_shards * tiles_per_shard * tm) != rows
    last_tile = num_tiles - 1

    def in_map(p, t):
        # Clamp so boundary shards never issue a fully out-of-bounds DMA; the
        # in-kernel mask zeroes any duplicated tile's contribution.
        return (jnp.minimum(p * tiles_per_shard + t, last_tile), 0)

    kernel = functools.partial(
        _hdr_loss_kernel,
        eps=float(eps),
        tm=tm,
        rows_valid=rows,
        tiles_per_shard=tiles_per_shard,
        needs_mask=needs_mask,
    )

    partials = pl.pallas_call(
        kernel,
        out_shape=jax.ShapeDtypeStruct((num_shards, 8, LANE), jnp.float32),
        grid_spec=pl.GridSpec(
            grid=(num_shards, tiles_per_shard),
            in_specs=[
                pl.BlockSpec((tm, LANE), in_map),
                pl.BlockSpec((tm, LANE), in_map),
            ],
            out_specs=pl.BlockSpec((1, 8, LANE), lambda p, t: (p, 0, 0)),
        ),
        compiler_params=pltpu.CompilerParams(
            dimension_semantics=("parallel", "arbitrary"),
            vmem_limit_bytes=32 * 1024 * 1024,
        ),
    )(d2, t2)

    # Tiny cross-shard combine + divide by the TRUE element count.
    return jnp.sum(partials) / jnp.float32(n_elems)


def hdr_loss_ref(denoised, target, eps=0.01):
    """Pure-JAX reference matching the PyTorch module exactly."""
    d = denoised.astype(jnp.float32)
    t = target.astype(jnp.float32)
    loss = (d - t) ** 2 / (d + eps) ** 2
    return jnp.mean(loss.reshape(-1))


if __name__ == "__main__":
    key = jax.random.PRNGKey(0)
    k1, k2 = jax.random.split(key)

    # NCHW: batch=2, channels=4, spatial=16x16
    shape = (2, 4, 16, 16)
    # HDR render buffers are non-negative; keep values positive so denom is well-behaved.
    denoised = jax.random.uniform(k1, shape, dtype=jnp.float32, minval=0.0, maxval=4.0)
    target = jax.random.uniform(k2, shape, dtype=jnp.float32, minval=0.0, maxval=4.0)

    out = hdr_loss(denoised, target, eps=0.01)
    out = jax.block_until_ready(out)

    ref = hdr_loss_ref(denoised, target, eps=0.01)
    assert jnp.allclose(out, ref, rtol=1e-5, atol=1e-6), (out, ref)

    print("KERNEL_OK")
</pallas_src>

<mosaic_0001>
module attributes {stable_mosaic.version = 11 : i64} {
  func.func @_hdr_loss_kernel(%arg0: i32, %arg1: i32, %arg2: memref<16x128xf32, #tpu.memory_space<vmem>>, %arg3: memref<16x128xf32, #tpu.memory_space<vmem>>, %arg4: memref<1x8x128xf32, #tpu.memory_space<vmem>>) attributes {dimension_semantics = [#tpu.dimension_semantics<parallel>, #tpu.dimension_semantics<arbitrary>], iteration_bounds = array<i64: 1, 1>, scalar_prefetch = 0 : i64, scratch_operands = 0 : i64, tpu.core_type = #tpu.core_type<tc>, window_params = [{transform_indices = @transform_0, window_bounds = array<i64: 16, 128>}, {transform_indices = @transform_1, window_bounds = array<i64: 16, 128>}, {transform_indices = @transform_2, window_bounds = array<i64: 1, 8, 128>}]} {
    %c0_i32 = arith.constant 0 : i32
    %0 = arith.cmpi eq, %arg1, %c0_i32 : i32
    %1 = arith.extui %0 : i1 to i32
    %c0_i32_0 = arith.constant 0 : i32
    %2 = arith.cmpi ne, %1, %c0_i32_0 : i32
    scf.if %2 {
      %cst_11 = arith.constant 0.000000e+00 : f32
      %19 = vector.broadcast %cst_11 : f32 to vector<1x8x128xf32>
      %c0_12 = arith.constant 0 : index
      %c0_13 = arith.constant 0 : index
      %c0_14 = arith.constant 0 : index
      %20 = vector.load %arg4[%c0_12, %c0_13, %c0_14] : memref<1x8x128xf32, #tpu.memory_space<vmem>>, vector<1x8x128xf32>
      tpu.vector_store %arg4[%c0_12, %c0_13, %c0_14], %19 {strides = array<i32>} : memref<1x8x128xf32, #tpu.memory_space<vmem>>, vector<1x8x128xf32>,
    } else {
    }
    %c0 = arith.constant 0 : index
    %c0_1 = arith.constant 0 : index
    %3 = vector.load %arg2[%c0, %c0_1] : memref<16x128xf32, #tpu.memory_space<vmem>>, vector<16x128xf32>
    %c0_2 = arith.constant 0 : index
    %c0_3 = arith.constant 0 : index
    %4 = vector.load %arg3[%c0_2, %c0_3] : memref<16x128xf32, #tpu.memory_space<vmem>>, vector<16x128xf32>
    %5 = arith.subf %3, %4 : vector<16x128xf32>
    %cst = arith.constant 0.00999999977 : f32
    %6 = vector.broadcast %cst : f32 to vector<16x128xf32>
    %7 = arith.addf %3, %6 : vector<16x128xf32>
    %8 = tpu.reciprocal %7 : vector<16x128xf32> -> vector<16x128xf32>
    %9 = arith.mulf %5, %8 : vector<16x128xf32>
    %10 = arith.mulf %9, %9 : vector<16x128xf32>
    %11 = vector.shape_cast %10 : vector<16x128xf32> to vector<2x8x128xf32>
    %cst_4 = arith.constant dense<0.000000e+00> : vector<8x128xf32>
    %12 = vector.multi_reduction <add>, %11, %cst_4 [0] : vector<2x8x128xf32> to vector<8x128xf32>
    %c0_5 = arith.constant 0 : index
    %c0_6 = arith.constant 0 : index
    %c0_7 = arith.constant 0 : index
    %13 = vector.load %arg4[%c0_5, %c0_6, %c0_7] : memref<1x8x128xf32, #tpu.memory_space<vmem>>, vector<1x8x128xf32>
    %14 = vector.shape_cast %13 : vector<1x8x128xf32> to vector<8x128xf32>
    %15 = arith.addf %14, %12 : vector<8x128xf32>
    %c0_8 = arith.constant 0 : index
    %c0_9 = arith.constant 0 : index
    %c0_10 = arith.constant 0 : index
    %16 = vector.load %arg4[%c0_8, %c0_9, %c0_10] : memref<1x8x128xf32, #tpu.memory_space<vmem>>, vector<1x8x128xf32>
    %17 = vector.shape_cast %16 : vector<1x8x128xf32> to vector<8x128xf32>
    %18 = vector.shape_cast %15 : vector<8x128xf32> to vector<1x8x128xf32>
    tpu.vector_store %arg4[%c0_8, %c0_9, %c0_10], %18 {strides = array<i32>} : memref<1x8x128xf32, #tpu.memory_space<vmem>>, vector<1x8x128xf32>,
    return
  }
  func.func @transform_0(%arg0: i32, %arg1: i32) -> (i32, i32) {
    %c1_i32 = arith.constant 1 : i32
    %0 = arith.muli %arg0, %c1_i32 : i32
    %1 = arith.addi %0, %arg1 : i32
    %c0_i32 = arith.constant 0 : i32
    %2 = arith.minsi %1, %c0_i32 : i32
    %c0_i32_0 = arith.constant 0 : i32
    %c0_i32_1 = arith.constant 0 : i32
    return %2, %c0_i32_0 : i32, i32
  }
  func.func @transform_1(%arg0: i32, %arg1: i32) -> (i32, i32) {
    %c1_i32 = arith.constant 1 : i32
    %0 = arith.muli %arg0, %c1_i32 : i32
    %1 = arith.addi %0, %arg1 : i32
    %c0_i32 = arith.constant 0 : i32
    %2 = arith.minsi %1, %c0_i32 : i32
    %c0_i32_0 = arith.constant 0 : i32
    %c0_i32_1 = arith.constant 0 : i32
    return %2, %c0_i32_0 : i32, i32
  }
  func.func @transform_2(%arg0: i32, %arg1: i32) -> (i32, i32, i32) {
    %c0_i32 = arith.constant 0 : i32
    %c0_i32_0 = arith.constant 0 : i32
    %c0_i32_1 = arith.constant 0 : i32
    return %arg0, %c0_i32, %c0_i32_0 : i32, i32, i32
  }
}

</mosaic_0001>

<bundles_post_ra>
// kernel: tpu_custom_call.1
= control target key start
LH: loop header
LB: loop body
LE: loop exit
PB: predicated region body
PF: predicated region fallthrough
CT: control target
= control target key end

     0   :  { %7 = vsyncpa [#allocation3], 0  ;;  %s241_s0 = inlined_call_operand.hbm [shape: f32[16,128], index: 0, kind: input, shape index: {}]   ;;  %s242_s1 = inlined_call_operand.hbm [shape: f32[16,128], index: 1, kind: input, shape index: {}]   ;;  %s243_s2 = inlined_call_operand.hbm [shape: f32[1,8,128], index: 2, kind: output, shape index: {}]  }
   0x1   :  { %8 = vsyncpa [#allocation6], 0 }
   0x2   :  { %9 = vsyncpa [#allocation4], 0  ;;  %s185_s9 = smov [#allocation2]   ;;  %s113_s13 = scalar_lea.hbm %s241_s0, 256 }
   0x3   :  { %s21_s10 = sshll.u32 %s185_s9, 4  ;;  %p114_p0 = scmp.ne.s32.totalorder %s241_s0, %s113_s13  ;;  %s22_s10 = int_to_ptr.vmem [resolvable:$true] %s21_s10 }
   0x4   :  { %p117_p1 = scmp.lt.u32.totalorder %s113_s13, %s241_s0 }
   0x6   :  { %p119_p2 = pnand %p117_p1, %p114_p0 }
   0x8   :  { %122 = shalt.err (!%p119_p2)
}
   0x9   :  { %s123_s18 = scalar_lea.vmem %s22_s10, 256  ;;  %p128_p4 = scmp.lt.s32.totalorder %s22_s10, %s22_s10 }
   0xa   :  { %p124_p3 = scmp.ne.s32.totalorder %s22_s10, %s123_s18  ;;  %p129_p5 = scmp.lt.s32.totalorder %s123_s18, %s123_s18 }
   0xc   :  { %p130_p6 = por %p129_p5, %p128_p4 }
   0xe   :  { %p131_p7 = pnand %p130_p6, %p124_p3 }
  0x10   :  { %134 = shalt.err (!%p131_p7)
}
  0x11   :  { %s186_s19 = smov 128   ;;  %s187_s20 = smov 8  }
  0x12   :  { %27 = dma.hbm_to_vmem [thread:$0]  %s241_s0, 256, %s22_s10, [#allocation3], %s186_s19, %s186_s19, %s187_s20  }
  0x13   :  { %s188_s23 = smov [#allocation5]   ;;  %s135_s27 = scalar_lea.hbm %s242_s1, 256 }
  0x14   :  { %s39_s24 = sshll.u32 %s188_s23, 4  ;;  %p136_p8 = scmp.ne.s32.totalorder %s242_s1, %s135_s27  ;;  %s40_s24 = int_to_ptr.vmem [resolvable:$true] %s39_s24 }
  0x15   :  { %p139_p9 = scmp.lt.u32.totalorder %s135_s27, %s242_s1 }
  0x17   :  { %p141_p10 = pnand %p139_p9, %p136_p8 }
  0x19   :  { %144 = shalt.err (!%p141_p10)
}
  0x1a   :  { %s145_s4 = scalar_lea.vmem %s40_s24, 256  ;;  %p150_p12 = scmp.lt.s32.totalorder %s40_s24, %s40_s24 }
  0x1b   :  { %p146_p11 = scmp.ne.s32.totalorder %s40_s24, %s145_s4  ;;  %p151_p13 = scmp.lt.s32.totalorder %s145_s4, %s145_s4 }
  0x1d   :  { %p152_p0 = por %p151_p13, %p150_p12 }
  0x1f   :  { %p153_p1 = pnand %p152_p0, %p146_p11 }
  0x21   :  { %156 = shalt.err (!%p153_p1)
}
  0x22   :  { %45 = dma.hbm_to_vmem [thread:$0]  %s242_s1, 256, %s40_s24, [#allocation6], %s186_s19, %s186_s19, %s187_s20  }
  0x23   :  { %179 = dma.done.wait [#allocation3], 256  }
  0x24   :  { %180 = vsyncadd [#allocation3], 4294967040 }
  0x25   :  { %181 = dma.done.wait [#allocation6], 256  }
  0x26   :  { %182 = vsyncadd [#allocation6], 4294967040  ;;  %v65_v0 = vld [vmem:[#allocation2] sm:$0xff]  ;;  %v66_v1 = vld [vmem:[#allocation2 + $0x8] sm:$0xff]  ;;  %s189_s1 = smov [#allocation7]  }
  0x27   :  { %v71_v2 = vadd.f32 0.01, %v65_v0  ;;  %v72_v3 = vadd.f32 0.01, %v66_v1  ;;  %v67_v4 = vld [vmem:[#allocation5] sm:$0xff]  ;;  %v68_v5 = vld [vmem:[#allocation5 + $0x8] sm:$0xff] }
  0x28   :  { %v69_v6 = vsub.f32 %v65_v0, %v67_v4  ;;  %v70_v7 = vsub.f32 %v66_v1, %v68_v5  ;;  %s89_s6 = sshll.u32 %s189_s1, 4  ;;  %s90_s6 = int_to_ptr.vmem [resolvable:$true] %s89_s6 }
  0x29   :  { %109 = vrcp.f32 %v71_v2  ;;  %s157_s7 = scalar_lea.vmem %s90_s6, 128  ;;  %p162_p3 = scmp.lt.s32.totalorder %s90_s6, %s90_s6 }
  0x2a   :  { %111 = vrcp.f32 %v72_v3  ;;  %p158_p2 = scmp.ne.s32.totalorder %s90_s6, %s157_s7  ;;  %p163_p4 = scmp.lt.s32.totalorder %s157_s7, %s157_s7 }
  0x2c   :  { %p164_p5 = por %p163_p4, %p162_p3 }
  0x2e   :  { %p165_p6 = pnand %p164_p5, %p158_p2 }
  0x33   :  { %v110_v8 = vpop.eup %109 }
  0x34   :  { %v112_v9 = vpop.eup %111  ;;  %v75_v10 = vmul.f32 %v110_v8, %v69_v6 }
  0x35   :  { %v76_v11 = vmul.f32 %v112_v9, %v70_v7 }
  0x36   :  { %v77_v12 = vmul.f32 %v75_v10, %v75_v10 }
  0x37   :  { %v78_v13 = vmul.f32 %v76_v11, %v76_v11 }
  0x39   :  { %v79_v14 = vadd.f32 %v78_v13, %v77_v12 }
  0x3b   :  { %82 = vst [vmem:[#allocation7] sm:$0xff] %v79_v14 }
  0x3c   :  { %168 = shalt.err (!%p165_p6)
}
  0x3d   :  { %s169_s10 = scalar_lea.hbm %s243_s2, 128 }
  0x3e   :  { %p170_p7 = scmp.ne.s32.totalorder %s243_s2, %s169_s10  ;;  %p173_p8 = scmp.lt.u32.totalorder %s169_s10, %s243_s2 }
  0x40   :  { %p175_p9 = pnand %p173_p8, %p170_p7 }
  0x42   :  { %178 = shalt.err (!%p175_p9)
}
  0x43   :  { %92 = dma.vmem_to_hbm [thread:$0]  %s90_s6, 128, %s243_s2, [#allocation4]  }
  0x44   :  { %183 = dma.done.wait [#allocation4], 128  }
  0x45   :  { %184 = vsyncadd [#allocation4], 4294967168 }
  0x46   :  { %96 = vsyncpa [#allocation3], 1 }
  0x47   :  { %97 = vsyncpa [#allocation6], 1 }
  0x48   :  { %98 = vsyncpa [#allocation4], 1 }

</bundles_post_ra>
